<compile_context>
chip_gen: v7x
topology: tpu7x:2x2x1
jax: 0.10.0
libtpu: 0.0.40
codegen_flags: <defaults>
</compile_context>

<pallas_src>
import jax
import jax.numpy as jnp
from jax import lax
from jax.experimental import pallas as pl
from jax.experimental.pallas import tpu as pltpu


def _round_up(n: int, m: int) -> int:
    return ((n + m - 1) // m) * m


def _vmem_capacity_bytes() -> int:
    """Physical per-core VMEM (128 MiB on v5e/v6e, 64 MiB on v7x)."""
    try:
        info = pltpu.get_tpu_info()
        cap = getattr(info, "vmem_capacity_bytes", None)
        if cap:
            return int(cap)
    except Exception:
        pass
    return 64 * 1024 * 1024  # conservative (v7x-safe) fallback


# --------------------------------------------------------------------------- kernel


def rwkv_ffn_kernel(x_ref, lx_ref, tmk_ref, tmr_ref, wk_ref, wr_ref, wv_ref,
                    out_ref, acc_ref, xk_ref):
    """One (row-tile, ffn-chunk) grid step.

    x_ref, lx_ref : (TM, D)  f32   current rows of x / time-shifted x
    tmk_ref/tmr_ref: (1, D)  f32   time-mix parameters               (single-buffered)
    wk_ref        : (D, TF)  bf16  key.weight^T chunk                (canonical (K,N))
    wr_ref        : (D, D)   bf16  receptance.weight^T               (single-buffered)
    wv_ref        : (TF, D)  bf16  value.weight^T chunk
    out_ref       : (TM, D)        output rows (written on the last ffn chunk)
    acc_ref       : (TM, D)  f32   VMEM accumulator for vk across ffn chunks
    xk_ref        : (TM, D)  bf16  hoisted key time-mix, computed once per row tile
    """
    f = pl.program_id(1)
    nf = pl.num_programs(1)

    @pl.when(f == 0)
    def _():
        xs = x_ref[...]
        lx = lx_ref[...]
        # x*tmk + last_x*(1-tmk), written as lx + tmk*(x-lx) so (1-tmk) never materializes.
        xk_ref[...] = (lx + tmk_ref[...] * (xs - lx)).astype(jnp.bfloat16)
        acc_ref[...] = jnp.zeros_like(acc_ref)

    # k_chunk = xk @ Wk^T_chunk -> (TM, TF); canonical (M,K)x(K,N), no in-kernel transpose.
    k = jnp.dot(xk_ref[...], wk_ref[...], preferred_element_type=jnp.float32)
    k = jnp.maximum(k, 0.0)
    # vk += relu(k)^2 @ Wv^T_chunk -> (TM, D), accumulated in f32 across ffn chunks.
    acc_ref[...] += jnp.dot((k * k).astype(jnp.bfloat16), wv_ref[...],
                            preferred_element_type=jnp.float32)

    @pl.when(f == nf - 1)
    def _():
        xs = x_ref[...]
        lx = lx_ref[...]
        xr = (lx + tmr_ref[...] * (xs - lx)).astype(jnp.bfloat16)
        r = jnp.dot(xr, wr_ref[...], preferred_element_type=jnp.float32)
        out_ref[...] = (jax.nn.sigmoid(r) * acc_ref[...]).astype(out_ref.dtype)


# --------------------------------------------------------------------------- wrapper


def prepare_rwkv_ffn_params(time_mix_k, time_mix_r, wk, wr, wv):
    """One-time parameter prep (do at init, not per forward call).

    * bf16 cast of all weights (per-call casts were an extra HBM pass over the weights).
    * pre-transpose to (in, out) so the kernel runs canonical (M,K)x(K,N) matmuls.
    * zero-pad the ffn dim to a multiple of 128 so any lane-aligned chunk size divides it
      (padded columns/rows provably contribute 0 to the output).
    """
    D = wr.shape[0]
    F = wk.shape[0]
    F_pad = _round_up(F, 128)
    wk_t = jnp.swapaxes(wk, 0, 1).astype(jnp.bfloat16)   # (D, F)
    wv_t = jnp.swapaxes(wv, 0, 1).astype(jnp.bfloat16)   # (F, D)
    if F_pad != F:
        wk_t = jnp.pad(wk_t, ((0, 0), (0, F_pad - F)))
        wv_t = jnp.pad(wv_t, ((0, F_pad - F), (0, 0)))
    wr_t = jnp.swapaxes(wr, 0, 1).astype(jnp.bfloat16)   # (D, D)
    return {
        "tmk": time_mix_k.reshape(1, D).astype(jnp.float32),
        "tmr": time_mix_r.reshape(1, D).astype(jnp.float32),
        "wk_t": wk_t,
        "wr_t": wr_t,
        "wv_t": wv_t,
    }


def rwkv_feed_forward(x, state, params, *, block_m=None, block_f=None):
    """x: (B, T, D); state: (B, 1, D); params from prepare_rwkv_ffn_params.

    Returns (out: (B, T, D), new_state: (B, 1, D)).
    """
    B, T, D = x.shape
    F = params["wk_t"].shape[1]                  # (possibly padded) ffn dim
    out_dtype = x.dtype
    out_itemsize = jnp.dtype(out_dtype).itemsize

    # Time shift in the wrapper: row 0 of each batch takes that batch's state, the rest take
    # the previous row.  Batch boundaries never enter the kernel.
    # TODO(synk): for decode-style shapes the concat (and row padding) could be folded into a
    # (tm+1)-row BlockSpec window to save one HBM pass over the activations.
    last_x = jnp.concatenate([state.astype(x.dtype), x[:, :-1, :]], axis=1)

    rows = B * T
    x_flat = x.reshape(rows, D)
    lx_flat = last_x.reshape(rows, D)

    # ---- generation-aware block selection ------------------------------------------
    vmem_cap = _vmem_capacity_bytes()
    budget = int(vmem_cap * 0.80)

    # Resident weights (single f chunk, every weight DMA'd from HBM exactly once) when the
    # full bf16 weight set fits comfortably — the v5e/v6e (128 MiB) fast path.
    resident_w_bytes = 2 * (2 * D * F + D * D)
    if block_f is None:
        block_f = F if resident_w_bytes <= budget // 2 else 512
    if block_f >= F:
        tf = F
    else:
        tf = max(128, (min(block_f, F) // 128) * 128)
        while tf > 128 and F % tf != 0:          # largest multiple of 128 that divides F
            tf -= 128
    n_f = F // tf

    # Row tile: big enough to be MXU-bound on the streamed-weight path (arithmetic intensity
    # ~ block_m flop/byte), smaller default on 64-MiB (v7x) parts.
    if block_m is None:
        block_m = 1024 if vmem_cap >= (96 << 20) else 512
    rows8 = _round_up(rows, 8)
    tm = max(8, (min(block_m, rows8) // 8) * 8)

    wk_bufs = 1 if n_f == 1 else 2               # key/value chunks single-buffered iff resident

    def est(tm_):
        return (2 * 2 * tm_ * D * 4              # x, lx tiles (double-buffered, f32)
                + 2 * tm_ * D * out_itemsize     # out tile (double-buffered)
                + wk_bufs * D * tf * 2           # key.weight^T chunk(s), bf16
                + wk_bufs * tf * D * 2           # value.weight^T chunk(s), bf16
                + D * D * 2                      # receptance.weight^T (single-buffered)
                + tm_ * D * 4                    # acc scratch (f32)
                + tm_ * D * 2                    # xk scratch (bf16)
                + 2 * 2 * D * 4)                 # time-mix rows

    while tm > 8 and est(tm) > budget:
        tm = max(8, ((tm // 2 + 7) // 8) * 8)
    # TODO(synk): for very large D on 64-MiB parts, chunk the (D, D) receptance weight across
    # the f axis with a second (tm, D) f32 accumulator instead of shrinking tm.

    rows_pad = _round_up(rows, tm)
    if rows_pad != rows:
        pad = rows_pad - rows
        x_flat = jnp.pad(x_flat, ((0, pad), (0, 0)))
        lx_flat = jnp.pad(lx_flat, ((0, pad), (0, 0)))
    n_rows = rows_pad // tm

    # Scoped-VMEM limit: per-chip capacity (no flat 64 MiB clamp) with headroom over the
    # tile estimate.
    vmem_limit = int(min(vmem_cap * 0.85, max(32 * 1024 * 1024, int(est(tm) * 1.5))))

    # ---- pallas_call ----------------------------------------------------------------
    def build(single_buffer_const: bool):
        def const_spec(shape, index_map):
            if single_buffer_const:
                return pl.BlockSpec(shape, index_map, pipeline_mode=pl.Buffered(1))
            return pl.BlockSpec(shape, index_map)

        def maybe_const_spec(shape, index_map):
            # key/value chunks are constant-index only when there is a single f chunk.
            if n_f == 1:
                return const_spec(shape, index_map)
            return pl.BlockSpec(shape, index_map)

        in_specs = [
            pl.BlockSpec((tm, D), lambda i, f: (i, 0)),        # x rows
            pl.BlockSpec((tm, D), lambda i, f: (i, 0)),        # last_x rows
            const_spec((1, D), lambda i, f: (0, 0)),           # time_mix_k
            const_spec((1, D), lambda i, f: (0, 0)),           # time_mix_r
            maybe_const_spec((D, tf), lambda i, f: (0, f)),    # key.weight^T, F-chunked
            const_spec((D, D), lambda i, f: (0, 0)),           # receptance.weight^T
            maybe_const_spec((tf, D), lambda i, f: (f, 0)),    # value.weight^T, F-chunked
        ]
        return pl.pallas_call(
            rwkv_ffn_kernel,
            out_shape=jax.ShapeDtypeStruct((rows_pad, D), out_dtype),
            grid_spec=pltpu.PrefetchScalarGridSpec(
                num_scalar_prefetch=0,
                grid=(n_rows, n_f),
                in_specs=in_specs,
                out_specs=pl.BlockSpec((tm, D), lambda i, f: (i, 0)),
                scratch_shapes=[pltpu.VMEM((tm, D), jnp.float32),   # vk accumulator
                                pltpu.VMEM((tm, D), jnp.bfloat16)], # hoisted xk
            ),
            compiler_params=pltpu.CompilerParams(
                dimension_semantics=("parallel", "arbitrary"),
                vmem_limit_bytes=vmem_limit,
            ),
        )

    args = (x_flat, lx_flat, params["tmk"], params["tmr"],
            params["wk_t"], params["wr_t"], params["wv_t"])
    try:
        out_flat = build(True)(*args)
    except Exception:
        # Fallback for jax versions that reject pipeline_mode=pl.Buffered(1).
        out_flat = build(False)(*args)

    out = out_flat[:rows].reshape(B, T, D)
    new_state = x[:, -1:, :]            # trivial slice: done in XLA, not in the kernel
    return out, new_state


# --------------------------------------------------------------------------- reference


def rwkv_ref(x, state, tmk, tmr, wk, wr, wv, *, bf16_matmul=False):
    """Plain-JAX reference mirroring the PyTorch forward (weights in native (out, in) layout)."""
    last_x = jnp.concatenate([state, x[:, :-1, :]], axis=1)
    xk = x * tmk + last_x * (1.0 - tmk)
    xr = x * tmr + last_x * (1.0 - tmr)
    cast = (lambda a: a.astype(jnp.bfloat16)) if bf16_matmul else (lambda a: a)
    k = jnp.einsum("btd,fd->btf", cast(xk), cast(wk), preferred_element_type=jnp.float32)
    r = jnp.einsum("btd,od->bto", cast(xr), cast(wr), preferred_element_type=jnp.float32)
    k = jnp.maximum(k, 0.0)
    vk = jnp.einsum("btf,df->btd", cast(k * k), cast(wv), preferred_element_type=jnp.float32)
    return jax.nn.sigmoid(r) * vk, x[:, -1:, :]


# --------------------------------------------------------------------------- test


if __name__ == "__main__":
    B, T, DIM, FFN = 2, 8, 128, 256
    root = jax.random.PRNGKey(0)
    kx, ks, kk, kr, kv = jax.random.split(root, 5)

    # Parameter init per RwkvFeedForward.__init__ / reset_parameters:
    #   time_mix_k / time_mix_r: (1, 1, dim) ones; key/receptance/value: orthogonal Linear
    #   weights in PyTorch (out, in) layout.
    ortho = jax.nn.initializers.orthogonal()
    wk = ortho(kk, (FFN, DIM), jnp.float32)
    wr = ortho(kr, (DIM, DIM), jnp.float32)
    wv = ortho(kv, (DIM, FFN), jnp.float32)
    tmk_ones = jnp.ones((1, 1, DIM), jnp.float32)
    tmr_ones = jnp.ones((1, 1, DIM), jnp.float32)

    x = jax.random.normal(kx, (B, T, DIM), jnp.float32)
    state0 = jnp.zeros((B, 1, DIM), jnp.float32)   # state=None -> init_state zeros per batch

    # 1) Faithful module init (time_mix = ones); auto-tuned blocks (resident weights,
    #    single f chunk, single-buffered constant operands).
    params = prepare_rwkv_ffn_params(tmk_ones, tmr_ones, wk, wr, wv)
    out, new_state = rwkv_feed_forward(x, state0, params)
    jax.block_until_ready((out, new_state))
    ref, ref_state = rwkv_ref(x, state0, tmk_ones, tmr_ones, wk, wr, wv, bf16_matmul=True)
    assert jnp.allclose(out, ref, atol=2e-2, rtol=2e-2)
    assert jnp.allclose(new_state, ref_state)

    # 2) Non-trivial mixes + nonzero state; small blocks exercise the row-tiled "parallel"
    #    axis (2 steps) and the F-chunked accumulation / hoisted-xk path (2 chunks).
    tmk2 = jnp.full((1, 1, DIM), 0.25, jnp.float32)
    tmr2 = jnp.full((1, 1, DIM), 0.75, jnp.float32)
    state1 = jax.random.normal(ks, (B, 1, DIM), jnp.float32)
    params2 = prepare_rwkv_ffn_params(tmk2, tmr2, wk, wr, wv)
    out2, new_state2 = rwkv_feed_forward(x, state1, params2, block_m=8, block_f=128)
    jax.block_until_ready((out2, new_state2))
    ref2, ref2_state = rwkv_ref(x, state1, tmk2, tmr2, wk, wr, wv, bf16_matmul=True)
    assert jnp.allclose(out2, ref2, atol=2e-2, rtol=2e-2)
    assert jnp.allclose(new_state2, ref2_state)

    # Loose sanity check against the pure-f32 reference (bf16 MXU inputs lose mantissa bits).
    ref2_f32, _ = rwkv_ref(x, state1, tmk2, tmr2, wk, wr, wv, bf16_matmul=False)
    assert jnp.allclose(out2, ref2_f32, atol=0.25, rtol=0.25)

    # 3) ffn_dim not a multiple of 128 exercises the prep-time zero-padding path.
    FFN3 = 192
    kk3, kv3 = jax.random.split(jax.random.PRNGKey(7), 2)
    wk3 = ortho(kk3, (FFN3, DIM), jnp.float32)
    wv3 = ortho(kv3, (DIM, FFN3), jnp.float32)
    params3 = prepare_rwkv_ffn_params(tmk2, tmr2, wk3, wr, wv3)
    out3, _ = rwkv_feed_forward(x, state1, params3)
    jax.block_until_ready(out3)
    ref3, _ = rwkv_ref(x, state1, tmk2, tmr2, wk3, wr, wv3, bf16_matmul=True)
    assert jnp.allclose(out3, ref3, atol=2e-2, rtol=2e-2)

    print("KERNEL_OK")
</pallas_src>

<mosaic_0001>
module attributes {stable_mosaic.version = 11 : i64} {
  func.func @rwkv_ffn_kernel(%arg0: i32, %arg1: i32, %arg2: memref<16x128xf32, #tpu.memory_space<vmem>>, %arg3: memref<16x128xf32, #tpu.memory_space<vmem>>, %arg4: memref<1x128xf32, #tpu.memory_space<vmem>>, %arg5: memref<1x128xf32, #tpu.memory_space<vmem>>, %arg6: memref<128x256xbf16, #tpu.memory_space<vmem>>, %arg7: memref<128x128xbf16, #tpu.memory_space<vmem>>, %arg8: memref<256x128xbf16, #tpu.memory_space<vmem>>, %arg9: memref<16x128xf32, #tpu.memory_space<vmem>>, %arg10: memref<16x128xf32, #tpu.memory_space<vmem>>, %arg11: memref<16x128xbf16, #tpu.memory_space<vmem>>) attributes {dimension_semantics = [#tpu.dimension_semantics<parallel>, #tpu.dimension_semantics<arbitrary>], iteration_bounds = array<i64: 1, 1>, scalar_prefetch = 0 : i64, scratch_operands = 2 : i64, tpu.core_type = #tpu.core_type<tc>, window_params = [{transform_indices = @transform_0, window_bounds = array<i64: 16, 128>}, {transform_indices = @transform_1, window_bounds = array<i64: 16, 128>}, {pipeline_mode = #tpu.pipeline_mode<synchronous>, transform_indices = @transform_2, window_bounds = array<i64: 1, 128>}, {pipeline_mode = #tpu.pipeline_mode<synchronous>, transform_indices = @transform_3, window_bounds = array<i64: 1, 128>}, {pipeline_mode = #tpu.pipeline_mode<synchronous>, transform_indices = @transform_4, window_bounds = array<i64: 128, 256>}, {pipeline_mode = #tpu.pipeline_mode<synchronous>, transform_indices = @transform_5, window_bounds = array<i64: 128, 128>}, {pipeline_mode = #tpu.pipeline_mode<synchronous>, transform_indices = @transform_6, window_bounds = array<i64: 256, 128>}, {transform_indices = @transform_7, window_bounds = array<i64: 16, 128>}]} {
    %c0_i32 = arith.constant 0 : i32
    %0 = arith.cmpi eq, %arg1, %c0_i32 : i32
    %1 = arith.extui %0 : i1 to i32
    %c0_i32_0 = arith.constant 0 : i32
    %2 = arith.cmpi ne, %1, %c0_i32_0 : i32
    scf.if %2 {
      %c0_14 = arith.constant 0 : index
      %c0_15 = arith.constant 0 : index
      %18 = vector.load %arg2[%c0_14, %c0_15] : memref<16x128xf32, #tpu.memory_space<vmem>>, vector<16x128xf32>
      %c0_16 = arith.constant 0 : index
      %c0_17 = arith.constant 0 : index
      %19 = vector.load %arg3[%c0_16, %c0_17] : memref<16x128xf32, #tpu.memory_space<vmem>>, vector<16x128xf32>
      %c0_18 = arith.constant 0 : index
      %c0_19 = arith.constant 0 : index
      %20 = vector.load %arg4[%c0_18, %c0_19] : memref<1x128xf32, #tpu.memory_space<vmem>>, vector<1x128xf32>
      %21 = arith.subf %18, %19 : vector<16x128xf32>
      %22 = vector.broadcast %20 : vector<1x128xf32> to vector<16x128xf32>
      %23 = arith.mulf %22, %21 : vector<16x128xf32>
      %24 = arith.addf %19, %23 : vector<16x128xf32>
      %25 = arith.truncf %24 : vector<16x128xf32> to vector<16x128xbf16>
      %c0_20 = arith.constant 0 : index
      %c0_21 = arith.constant 0 : index
      %26 = vector.load %arg11[%c0_20, %c0_21] : memref<16x128xbf16, #tpu.memory_space<vmem>>, vector<16x128xbf16>
      tpu.vector_store %arg11[%c0_20, %c0_21], %25 {strides = array<i32>} : memref<16x128xbf16, #tpu.memory_space<vmem>>, vector<16x128xbf16>,
      %cst_22 = arith.constant 0.000000e+00 : f32
      %27 = vector.broadcast %cst_22 : f32 to vector<16x128xf32>
      %c0_23 = arith.constant 0 : index
      %c0_24 = arith.constant 0 : index
      %28 = vector.load %arg10[%c0_23, %c0_24] : memref<16x128xf32, #tpu.memory_space<vmem>>, vector<16x128xf32>
      tpu.vector_store %arg10[%c0_23, %c0_24], %27 {strides = array<i32>} : memref<16x128xf32, #tpu.memory_space<vmem>>, vector<16x128xf32>,
    } else {
    }
    %c0 = arith.constant 0 : index
    %c0_1 = arith.constant 0 : index
    %3 = vector.load %arg11[%c0, %c0_1] : memref<16x128xbf16, #tpu.memory_space<vmem>>, vector<16x128xbf16>
    %c0_2 = arith.constant 0 : index
    %c0_3 = arith.constant 0 : index
    %4 = vector.load %arg6[%c0_2, %c0_3] : memref<128x256xbf16, #tpu.memory_space<vmem>>, vector<128x256xbf16>
    %cst = arith.constant dense<0.000000e+00> : vector<16x256xf32>
    %5 = tpu.matmul %3, %4, %cst {dimension_numbers = #tpu.dot_dimension_numbers<[1], [0], [0], [1], [0, 0, 1, 1], [], []>} : vector<16x128xbf16>, vector<128x256xbf16>, vector<16x256xf32> -> vector<16x256xf32>
    %cst_4 = arith.constant 0.000000e+00 : f32
    %6 = vector.broadcast %cst_4 : f32 to vector<16x256xf32>
    %7 = arith.maximumf %5, %6 : vector<16x256xf32>
    %c0_5 = arith.constant 0 : index
    %c0_6 = arith.constant 0 : index
    %8 = vector.load %arg10[%c0_5, %c0_6] : memref<16x128xf32, #tpu.memory_space<vmem>>, vector<16x128xf32>
    %9 = arith.mulf %7, %7 : vector<16x256xf32>
    %10 = arith.truncf %9 : vector<16x256xf32> to vector<16x256xbf16>
    %c0_7 = arith.constant 0 : index
    %c0_8 = arith.constant 0 : index
    %11 = vector.load %arg8[%c0_7, %c0_8] : memref<256x128xbf16, #tpu.memory_space<vmem>>, vector<256x128xbf16>
    %cst_9 = arith.constant dense<0.000000e+00> : vector<16x128xf32>
    %12 = tpu.matmul %10, %11, %cst_9 {dimension_numbers = #tpu.dot_dimension_numbers<[1], [0], [0], [1], [0, 0, 1, 1], [], []>} : vector<16x256xbf16>, vector<256x128xbf16>, vector<16x128xf32> -> vector<16x128xf32>
    %13 = arith.addf %8, %12 : vector<16x128xf32>
    %c0_10 = arith.constant 0 : index
    %c0_11 = arith.constant 0 : index
    %14 = vector.load %arg10[%c0_10, %c0_11] : memref<16x128xf32, #tpu.memory_space<vmem>>, vector<16x128xf32>
    tpu.vector_store %arg10[%c0_10, %c0_11], %13 {strides = array<i32>} : memref<16x128xf32, #tpu.memory_space<vmem>>, vector<16x128xf32>,
    %c0_i32_12 = arith.constant 0 : i32
    %15 = arith.cmpi eq, %arg1, %c0_i32_12 : i32
    %16 = arith.extui %15 : i1 to i32
    %c0_i32_13 = arith.constant 0 : i32
    %17 = arith.cmpi ne, %16, %c0_i32_13 : i32
    scf.if %17 {
      %c0_14 = arith.constant 0 : index
      %c0_15 = arith.constant 0 : index
      %18 = vector.load %arg2[%c0_14, %c0_15] : memref<16x128xf32, #tpu.memory_space<vmem>>, vector<16x128xf32>
      %c0_16 = arith.constant 0 : index
      %c0_17 = arith.constant 0 : index
      %19 = vector.load %arg3[%c0_16, %c0_17] : memref<16x128xf32, #tpu.memory_space<vmem>>, vector<16x128xf32>
      %c0_18 = arith.constant 0 : index
      %c0_19 = arith.constant 0 : index
      %20 = vector.load %arg5[%c0_18, %c0_19] : memref<1x128xf32, #tpu.memory_space<vmem>>, vector<1x128xf32>
      %21 = arith.subf %18, %19 : vector<16x128xf32>
      %22 = vector.broadcast %20 : vector<1x128xf32> to vector<16x128xf32>
      %23 = arith.mulf %22, %21 : vector<16x128xf32>
      %24 = arith.addf %19, %23 : vector<16x128xf32>
      %25 = arith.truncf %24 : vector<16x128xf32> to vector<16x128xbf16>
      %c0_20 = arith.constant 0 : index
      %c0_21 = arith.constant 0 : index
      %26 = vector.load %arg7[%c0_20, %c0_21] : memref<128x128xbf16, #tpu.memory_space<vmem>>, vector<128x128xbf16>
      %cst_22 = arith.constant dense<0.000000e+00> : vector<16x128xf32>
      %27 = tpu.matmul %25, %26, %cst_22 {dimension_numbers = #tpu.dot_dimension_numbers<[1], [0], [0], [1], [0, 0, 1, 1], [], []>} : vector<16x128xbf16>, vector<128x128xbf16>, vector<16x128xf32> -> vector<16x128xf32>
      %28 = arith.negf %27 : vector<16x128xf32>
      %29 = math.exp %28 : vector<16x128xf32>
      %cst_23 = arith.constant 1.000000e+00 : f32
      %30 = vector.broadcast %cst_23 : f32 to vector<16x128xf32>
      %31 = arith.addf %30, %29 : vector<16x128xf32>
      %32 = arith.divf %30, %31 : vector<16x128xf32>
      %c0_24 = arith.constant 0 : index
      %c0_25 = arith.constant 0 : index
      %33 = vector.load %arg10[%c0_24, %c0_25] : memref<16x128xf32, #tpu.memory_space<vmem>>, vector<16x128xf32>
      %34 = arith.mulf %32, %33 : vector<16x128xf32>
      %c0_26 = arith.constant 0 : index
      %c0_27 = arith.constant 0 : index
      %35 = vector.load %arg9[%c0_26, %c0_27] : memref<16x128xf32, #tpu.memory_space<vmem>>, vector<16x128xf32>
      tpu.vector_store %arg9[%c0_26, %c0_27], %34 {strides = array<i32>} : memref<16x128xf32, #tpu.memory_space<vmem>>, vector<16x128xf32>,
    } else {
    }
    return
  }
  func.func @transform_0(%arg0: i32, %arg1: i32) -> (i32, i32) {
    %c0_i32 = arith.constant 0 : i32
    %c0_i32_0 = arith.constant 0 : i32
    return %arg0, %c0_i32 : i32, i32
  }
  func.func @transform_1(%arg0: i32, %arg1: i32) -> (i32, i32) {
    %c0_i32 = arith.constant 0 : i32
    %c0_i32_0 = arith.constant 0 : i32
    return %arg0, %c0_i32 : i32, i32
  }
  func.func @transform_2(%arg0: i32, %arg1: i32) -> (i32, i32) {
    %c0_i32 = arith.constant 0 : i32
    %c0_i32_0 = arith.constant 0 : i32
    %c0_i32_1 = arith.constant 0 : i32
    return %c0_i32, %c0_i32_0 : i32, i32
  }
  func.func @transform_3(%arg0: i32, %arg1: i32) -> (i32, i32) {
    %c0_i32 = arith.constant 0 : i32
    %c0_i32_0 = arith.constant 0 : i32
    %c0_i32_1 = arith.constant 0 : i32
    return %c0_i32, %c0_i32_0 : i32, i32
  }
  func.func @transform_4(%arg0: i32, %arg1: i32) -> (i32, i32) {
    %c0_i32 = arith.constant 0 : i32
    %c0_i32_0 = arith.constant 0 : i32
    return %c0_i32, %arg1 : i32, i32
  }
  func.func @transform_5(%arg0: i32, %arg1: i32) -> (i32, i32) {
    %c0_i32 = arith.constant 0 : i32
    %c0_i32_0 = arith.constant 0 : i32
    %c0_i32_1 = arith.constant 0 : i32
    return %c0_i32, %c0_i32_0 : i32, i32
  }
  func.func @transform_6(%arg0: i32, %arg1: i32) -> (i32, i32) {
    %c0_i32 = arith.constant 0 : i32
    %c0_i32_0 = arith.constant 0 : i32
    return %arg1, %c0_i32 : i32, i32
  }
  func.func @transform_7(%arg0: i32, %arg1: i32) -> (i32, i32) {
    %c0_i32 = arith.constant 0 : i32
    %c0_i32_0 = arith.constant 0 : i32
    return %arg0, %c0_i32 : i32, i32
  }
}

module attributes {stable_mosaic.version = 11 : i64} {
  func.func @rwkv_ffn_kernel(%arg0: i32, %arg1: i32, %arg2: memref<16x128xf32, #tpu.memory_space<vmem>>, %arg3: memref<16x128xf32, #tpu.memory_space<vmem>>, %arg4: memref<1x128xf32, #tpu.memory_space<vmem>>, %arg5: memref<1x128xf32, #tpu.memory_space<vmem>>, %arg6: memref<128x256xbf16, #tpu.memory_space<vmem>>, %arg7: memref<128x128xbf16, #tpu.memory_space<vmem>>, %arg8: memref<256x128xbf16, #tpu.memory_space<vmem>>, %arg9: memref<16x128xf32, #tpu.memory_space<vmem>>, %arg10: memref<16x128xf32, #tpu.memory_space<vmem>>, %arg11: memref<16x128xbf16, #tpu.memory_space<vmem>>) attributes {dimension_semantics = [#tpu.dimension_semantics<parallel>, #tpu.dimension_semantics<arbitrary>], iteration_bounds = array<i64: 1, 1>, scalar_prefetch = 0 : i64, scratch_operands = 2 : i64, tpu.core_type = #tpu.core_type<tc>, window_params = [{transform_indices = @transform_0, window_bounds = array<i64: 16, 128>}, {transform_indices = @transform_1, window_bounds = array<i64: 16, 128>}, {pipeline_mode = #tpu.pipeline_mode<synchronous>, transform_indices = @transform_2, window_bounds = array<i64: 1, 128>}, {pipeline_mode = #tpu.pipeline_mode<synchronous>, transform_indices = @transform_3, window_bounds = array<i64: 1, 128>}, {transform_indices = @transform_4, window_bounds = array<i64: 128, 256>}, {pipeline_mode = #tpu.pipeline_mode<synchronous>, transform_indices = @transform_5, window_bounds = array<i64: 128, 128>}, {transform_indices = @transform_6, window_bounds = array<i64: 256, 128>}, {transform_indices = @transform_7, window_bounds = array<i64: 16, 128>}]} {
    %c0_i32 = arith.constant 0 : i32
    %0 = arith.cmpi eq, %arg1, %c0_i32 : i32
    %1 = arith.extui %0 : i1 to i32
    %c0_i32_0 = arith.constant 0 : i32
    %2 = arith.cmpi ne, %1, %c0_i32_0 : i32
    scf.if %2 {
      %c0_14 = arith.constant 0 : index
      %c0_15 = arith.constant 0 : index
      %18 = vector.load %arg2[%c0_14, %c0_15] : memref<16x128xf32, #tpu.memory_space<vmem>>, vector<16x128xf32>
      %c0_16 = arith.constant 0 : index
      %c0_17 = arith.constant 0 : index
      %19 = vector.load %arg3[%c0_16, %c0_17] : memref<16x128xf32, #tpu.memory_space<vmem>>, vector<16x128xf32>
      %c0_18 = arith.constant 0 : index
      %c0_19 = arith.constant 0 : index
      %20 = vector.load %arg4[%c0_18, %c0_19] : memref<1x128xf32, #tpu.memory_space<vmem>>, vector<1x128xf32>
      %21 = arith.subf %18, %19 : vector<16x128xf32>
      %22 = vector.broadcast %20 : vector<1x128xf32> to vector<16x128xf32>
      %23 = arith.mulf %22, %21 : vector<16x128xf32>
      %24 = arith.addf %19, %23 : vector<16x128xf32>
      %25 = arith.truncf %24 : vector<16x128xf32> to vector<16x128xbf16>
      %c0_20 = arith.constant 0 : index
      %c0_21 = arith.constant 0 : index
      %26 = vector.load %arg11[%c0_20, %c0_21] : memref<16x128xbf16, #tpu.memory_space<vmem>>, vector<16x128xbf16>
      tpu.vector_store %arg11[%c0_20, %c0_21], %25 {strides = array<i32>} : memref<16x128xbf16, #tpu.memory_space<vmem>>, vector<16x128xbf16>,
      %cst_22 = arith.constant 0.000000e+00 : f32
      %27 = vector.broadcast %cst_22 : f32 to vector<16x128xf32>
      %c0_23 = arith.constant 0 : index
      %c0_24 = arith.constant 0 : index
      %28 = vector.load %arg10[%c0_23, %c0_24] : memref<16x128xf32, #tpu.memory_space<vmem>>, vector<16x128xf32>
      tpu.vector_store %arg10[%c0_23, %c0_24], %27 {strides = array<i32>} : memref<16x128xf32, #tpu.memory_space<vmem>>, vector<16x128xf32>,
    } else {
    }
    %c0 = arith.constant 0 : index
    %c0_1 = arith.constant 0 : index
    %3 = vector.load %arg11[%c0, %c0_1] : memref<16x128xbf16, #tpu.memory_space<vmem>>, vector<16x128xbf16>
    %c0_2 = arith.constant 0 : index
    %c0_3 = arith.constant 0 : index
    %4 = vector.load %arg6[%c0_2, %c0_3] : memref<128x256xbf16, #tpu.memory_space<vmem>>, vector<128x256xbf16>
    %cst = arith.constant dense<0.000000e+00> : vector<16x256xf32>
    %5 = tpu.matmul %3, %4, %cst {dimension_numbers = #tpu.dot_dimension_numbers<[1], [0], [0], [1], [0, 0, 1, 1], [], []>} : vector<16x128xbf16>, vector<128x256xbf16>, vector<16x256xf32> -> vector<16x256xf32>
    %cst_4 = arith.constant 0.000000e+00 : f32
    %6 = vector.broadcast %cst_4 : f32 to vector<16x256xf32>
    %7 = arith.maximumf %5, %6 : vector<16x256xf32>
    %c0_5 = arith.constant 0 : index
    %c0_6 = arith.constant 0 : index
    %8 = vector.load %arg10[%c0_5, %c0_6] : memref<16x128xf32, #tpu.memory_space<vmem>>, vector<16x128xf32>
    %9 = arith.mulf %7, %7 : vector<16x256xf32>
    %10 = arith.truncf %9 : vector<16x256xf32> to vector<16x256xbf16>
    %c0_7 = arith.constant 0 : index
    %c0_8 = arith.constant 0 : index
    %11 = vector.load %arg8[%c0_7, %c0_8] : memref<256x128xbf16, #tpu.memory_space<vmem>>, vector<256x128xbf16>
    %cst_9 = arith.constant dense<0.000000e+00> : vector<16x128xf32>
    %12 = tpu.matmul %10, %11, %cst_9 {dimension_numbers = #tpu.dot_dimension_numbers<[1], [0], [0], [1], [0, 0, 1, 1], [], []>} : vector<16x256xbf16>, vector<256x128xbf16>, vector<16x128xf32> -> vector<16x128xf32>
    %13 = arith.addf %8, %12 : vector<16x128xf32>
    %c0_10 = arith.constant 0 : index
    %c0_11 = arith.constant 0 : index
    %14 = vector.load %arg10[%c0_10, %c0_11] : memref<16x128xf32, #tpu.memory_space<vmem>>, vector<16x128xf32>
    tpu.vector_store %arg10[%c0_10, %c0_11], %13 {strides = array<i32>} : memref<16x128xf32, #tpu.memory_space<vmem>>, vector<16x128xf32>,
    %c0_i32_12 = arith.constant 0 : i32
    %15 = arith.cmpi eq, %arg1, %c0_i32_12 : i32
    %16 = arith.extui %15 : i1 to i32
    %c0_i32_13 = arith.constant 0 : i32
    %17 = arith.cmpi ne, %16, %c0_i32_13 : i32
    scf.if %17 {
      %c0_14 = arith.constant 0 : index
      %c0_15 = arith.constant 0 : index
      %18 = vector.load %arg2[%c0_14, %c0_15] : memref<16x128xf32, #tpu.memory_space<vmem>>, vector<16x128xf32>
      %c0_16 = arith.constant 0 : index
      %c0_17 = arith.constant 0 : index
      %19 = vector.load %arg3[%c0_16, %c0_17] : memref<16x128xf32, #tpu.memory_space<vmem>>, vector<16x128xf32>
      %c0_18 = arith.constant 0 : index
      %c0_19 = arith.constant 0 : index
      %20 = vector.load %arg5[%c0_18, %c0_19] : memref<1x128xf32, #tpu.memory_space<vmem>>, vector<1x128xf32>
      %21 = arith.subf %18, %19 : vector<16x128xf32>
      %22 = vector.broadcast %20 : vector<1x128xf32> to vector<16x128xf32>
      %23 = arith.mulf %22, %21 : vector<16x128xf32>
      %24 = arith.addf %19, %23 : vector<16x128xf32>
      %25 = arith.truncf %24 : vector<16x128xf32> to vector<16x128xbf16>
      %c0_20 = arith.constant 0 : index
      %c0_21 = arith.constant 0 : index
      %26 = vector.load %arg7[%c0_20, %c0_21] : memref<128x128xbf16, #tpu.memory_space<vmem>>, vector<128x128xbf16>
      %cst_22 = arith.constant dense<0.000000e+00> : vector<16x128xf32>
      %27 = tpu.matmul %25, %26, %cst_22 {dimension_numbers = #tpu.dot_dimension_numbers<[1], [0], [0], [1], [0, 0, 1, 1], [], []>} : vector<16x128xbf16>, vector<128x128xbf16>, vector<16x128xf32> -> vector<16x128xf32>
      %28 = arith.negf %27 : vector<16x128xf32>
      %29 = math.exp %28 : vector<16x128xf32>
      %cst_23 = arith.constant 1.000000e+00 : f32
      %30 = vector.broadcast %cst_23 : f32 to vector<16x128xf32>
      %31 = arith.addf %30, %29 : vector<16x128xf32>
      %32 = arith.divf %30, %31 : vector<16x128xf32>
      %c0_24 = arith.constant 0 : index
      %c0_25 = arith.constant 0 : index
      %33 = vector.load %arg10[%c0_24, %c0_25] : memref<16x128xf32, #tpu.memory_space<vmem>>, vector<16x128xf32>
      %34 = arith.mulf %32, %33 : vector<16x128xf32>
      %c0_26 = arith.constant 0 : index
      %c0_27 = arith.constant 0 : index
      %35 = vector.load %arg9[%c0_26, %c0_27] : memref<16x128xf32, #tpu.memory_space<vmem>>, vector<16x128xf32>
      tpu.vector_store %arg9[%c0_26, %c0_27], %34 {strides = array<i32>} : memref<16x128xf32, #tpu.memory_space<vmem>>, vector<16x128xf32>,
    } else {
    }
    return
  }
  func.func @transform_0(%arg0: i32, %arg1: i32) -> (i32, i32) {
    %c0_i32 = arith.constant 0 : i32
    %c0_i32_0 = arith.constant 0 : i32
    return %arg0, %c0_i32 : i32, i32
  }
  func.func @transform_1(%arg0: i32, %arg1: i32) -> (i32, i32) {
    %c0_i32 = arith.constant 0 : i32
    %c0_i32_0 = arith.constant 0 : i32
    return %arg0, %c0_i32 : i32, i32
  }
  func.func @transform_2(%arg0: i32, %arg1: i32) -> (i32, i32) {
    %c0_i32 = arith.constant 0 : i32
    %c0_i32_0 = arith.constant 0 : i32
    %c0_i32_1 = arith.constant 0 : i32
    return %c0_i32, %c0_i32_0 : i32, i32
  }
  func.func @transform_3(%arg0: i32, %arg1: i32) -> (i32, i32) {
    %c0_i32 = arith.constant 0 : i32
    %c0_i32_0 = arith.constant 0 : i32
    %c0_i32_1 = arith.constant 0 : i32
    return %c0_i32, %c0_i32_0 : i32, i32
  }
  func.func @transform_4(%arg0: i32, %arg1: i32) -> (i32, i32) {
    %c0_i32 = arith.constant 0 : i32
    %c0_i32_0 = arith.constant 0 : i32
    return %c0_i32, %arg1 : i32, i32
  }
  func.func @transform_5(%arg0: i32, %arg1: i32) -> (i32, i32) {
    %c0_i32 = arith.constant 0 : i32
    %c0_i32_0 = arith.constant 0 : i32
    %c0_i32_1 = arith.constant 0 : i32
    return %c0_i32, %c0_i32_0 : i32, i32
  }
  func.func @transform_6(%arg0: i32, %arg1: i32) -> (i32, i32) {
    %c0_i32 = arith.constant 0 : i32
    %c0_i32_0 = arith.constant 0 : i32
    return %arg1, %c0_i32 : i32, i32
  }
  func.func @transform_7(%arg0: i32, %arg1: i32) -> (i32, i32) {
    %c0_i32 = arith.constant 0 : i32
    %c0_i32_0 = arith.constant 0 : i32
    return %arg0, %c0_i32 : i32, i32
  }
}

</mosaic_0001>

<bundles_post_ra>
// kernel: tpu_custom_call.1
= control target key start
LH: loop header
LB: loop body
LE: loop exit
PB: predicated region body
PF: predicated region fallthrough
CT: control target
= control target key end

     0   :  { %12 = vsyncpa [#allocation5], 0  ;;  %s1086_s0 = inlined_call_operand.hbm [shape: f32[16,128], index: 0, kind: input, shape index: {}]   ;;  %s1087_s1 = inlined_call_operand.hbm [shape: f32[16,128], index: 1, kind: input, shape index: {}]   ;;  %s1088_s2 = inlined_call_operand.vmem [shape: f32[1,128], index: 2, kind: input, shape index: {}]   ;;  %s1089_s3 = inlined_call_operand.vmem [shape: f32[1,128], index: 3, kind: input, shape index: {}]   ;;  %s1090_s4 = inlined_call_operand.hbm [shape: bf16[128,256], index: 4, kind: input, shape index: {}]   ;;  %s1091_s5 = inlined_call_operand.hbm [shape: bf16[128,128], index: 5, kind: input, shape index: {}]   ;;  %s1092_s6 = inlined_call_operand.hbm [shape: bf16[256,128], index: 6, kind: input, shape index: {}]   ;;  %s1093_s7 = inlined_call_operand.hbm [shape: f32[16,128], index: 7, kind: output, shape index: {}]  }
   0x1   :  { %13 = vsyncpa [#allocation8], 0 }
   0x2   :  { %14 = vsyncpa [#allocation11], 0 }
   0x3   :  { %15 = vsyncpa [#allocation6], 0  ;;  %s913_s24 = smov [#allocation7]   ;;  %s914_s26 = smov [#allocation10]  }
   0x4   :  { %s33_s25 = sshll.u32 %s913_s24, 4  ;;  %s61_s27 = sshll.u32 %s914_s26, 4  ;;  %s34_s25 = int_to_ptr.vmem [resolvable:$true] %s33_s25  ;;  %s966_s27 = int_to_ptr.vmem [resolvable:$true] %s61_s27 }
   0x5   :  { %s773_s30 = scalar_lea.hbm %s1087_s1, 256 }
   0x6   :  { %p774_p0 = scmp.ne.s32.totalorder %s1087_s1, %s773_s30  ;;  %p777_p1 = scmp.lt.u32.totalorder %s773_s30, %s1087_s1 }
   0x8   :  { %p779_p2 = pnand %p777_p1, %p774_p0 }
   0xa   :  { %782 = shalt.err (!%p779_p2)
}
   0xb   :  { %s783_s12 = scalar_lea.vmem %s34_s25, 256  ;;  %p788_p4 = scmp.lt.s32.totalorder %s34_s25, %s34_s25 }
   0xc   :  { %p784_p3 = scmp.ne.s32.totalorder %s34_s25, %s783_s12  ;;  %p789_p5 = scmp.lt.s32.totalorder %s783_s12, %s783_s12 }
   0xe   :  { %p790_p6 = por %p789_p5, %p788_p4 }
  0x10   :  { %p791_p7 = pnand %p790_p6, %p784_p3 }
  0x12   :  { %794 = shalt.err (!%p791_p7)
}
  0x13   :  { %s915_s13 = smov 128   ;;  %s916_s14 = smov 8  }
  0x14   :  { %39 = dma.hbm_to_vmem [thread:$0]  %s1087_s1, 256, %s34_s25, [#allocation8], %s915_s13, %s915_s13, %s916_s14  }
  0x15   :  { %s795_s19 = scalar_lea.hbm %s1091_s5, 1024 }
  0x16   :  { %p796_p8 = scmp.ne.s32.totalorder %s1091_s5, %s795_s19  ;;  %p799_p9 = scmp.lt.u32.totalorder %s795_s19, %s1091_s5 }
  0x18   :  { %p801_p10 = pnand %p799_p9, %p796_p8 }
  0x1a   :  { %804 = shalt.err (!%p801_p10)
}
  0x1b   :  { %s805_s24 = scalar_lea.vmem %s966_s27, 1024  ;;  %p810_p12 = scmp.lt.s32.totalorder %s966_s27, %s966_s27 }
  0x1c   :  { %p806_p11 = scmp.ne.s32.totalorder %s966_s27, %s805_s24  ;;  %p811_p13 = scmp.lt.s32.totalorder %s805_s24, %s805_s24 }
  0x1e   :  { %p812_p0 = por %p811_p13, %p810_p12 }
  0x20   :  { %p813_p1 = pnand %p812_p0, %p806_p11 }
  0x22   :  { %816 = shalt.err (!%p813_p1)
}
  0x23   :  { %s917_s1 = smov 64   ;;  %s918_s25 = smov 4  }
  0x24   :  { %67 = dma.hbm_to_vmem [thread:$0]  %s1091_s5, 1024, %s966_s27, [#allocation11], %s917_s1, %s917_s1, %s918_s25  }
  0x25   :  { %s919_s29 = smov [#allocation4]   ;;  %s920_s8 = smov [#allocation9]  }
  0x26   :  { %s21_s30 = sshll.u32 %s919_s29, 4  ;;  %s49_s9 = sshll.u32 %s920_s8, 4  ;;  %s22_s30 = int_to_ptr.vmem [resolvable:$true] %s21_s30  ;;  %s1003_s9 = int_to_ptr.vmem [resolvable:$true] %s49_s9 }
  0x27   :  { %s817_s12 = scalar_lea.hbm %s1086_s0, 256 }
  0x28   :  { %p818_p2 = scmp.ne.s32.totalorder %s1086_s0, %s817_s12  ;;  %p821_p3 = scmp.lt.u32.totalorder %s817_s12, %s1086_s0 }
  0x2a   :  { %p823_p4 = pnand %p821_p3, %p818_p2 }
  0x2c   :  { %826 = shalt.err (!%p823_p4)
}
  0x2d   :  { %s827_s5 = scalar_lea.vmem %s22_s30, 256  ;;  %p832_p6 = scmp.lt.s32.totalorder %s22_s30, %s22_s30 }
  0x2e   :  { %p828_p5 = scmp.ne.s32.totalorder %s22_s30, %s827_s5  ;;  %p833_p7 = scmp.lt.s32.totalorder %s827_s5, %s827_s5 }
  0x30   :  { %p834_p8 = por %p833_p7, %p832_p6 }
  0x32   :  { %p835_p9 = pnand %p834_p8, %p828_p5 }
  0x34   :  { %838 = shalt.err (!%p835_p9)
}
  0x35   :  { %27 = dma.hbm_to_vmem [thread:$0]  %s1086_s0, 256, %s22_s30, [#allocation5], %s915_s13, %s915_s13, %s916_s14  }
  0x36   :  { %s839_s22 = scalar_lea.hbm %s1090_s4, 2048 }
  0x37   :  { %p840_p10 = scmp.ne.s32.totalorder %s1090_s4, %s839_s22  ;;  %p843_p11 = scmp.lt.u32.totalorder %s839_s22, %s1090_s4 }
  0x39   :  { %p845_p12 = pnand %p843_p11, %p840_p10 }
  0x3b   :  { %848 = shalt.err (!%p845_p12)
}
  0x3c   :  { %s849_s29 = scalar_lea.vmem %s1003_s9, 2048  ;;  %p854_p0 = scmp.lt.s32.totalorder %s1003_s9, %s1003_s9 }
  0x3d   :  { %p850_p13 = scmp.ne.s32.totalorder %s1003_s9, %s849_s29  ;;  %p855_p1 = scmp.lt.s32.totalorder %s849_s29, %s849_s29 }
  0x3f   :  { %p856_p2 = por %p855_p1, %p854_p0 }
  0x41   :  { %p857_p3 = pnand %p856_p2, %p850_p13 }
  0x43   :  { %860 = shalt.err (!%p857_p3)
}
  0x44   :  { %55 = dma.hbm_to_vmem [thread:$0]  %s1090_s4, 2048, %s1003_s9, [#allocation8], %s915_s13, %s915_s13, %s916_s14  }
  0x45   :  { %s921_s8 = smov [#allocation12]   ;;  %s861_s15 = scalar_lea.hbm %s1092_s6, 2048 }
  0x46   :  { %s73_s10 = sshll.u32 %s921_s8, 4  ;;  %p862_p4 = scmp.ne.s32.totalorder %s1092_s6, %s861_s15  ;;  %s74_s10 = int_to_ptr.vmem [resolvable:$true] %s73_s10 }
  0x47   :  { %p865_p5 = scmp.lt.u32.totalorder %s861_s15, %s1092_s6 }
  0x49   :  { %p867_p6 = pnand %p865_p5, %p862_p4 }
  0x4b   :  { %870 = shalt.err (!%p867_p6)
}
  0x4c   :  { %s871_s27 = scalar_lea.vmem %s74_s10, 2048  ;;  %p876_p8 = scmp.lt.s32.totalorder %s74_s10, %s74_s10 }
  0x4d   :  { %p872_p7 = scmp.ne.s32.totalorder %s74_s10, %s871_s27  ;;  %p877_p9 = scmp.lt.s32.totalorder %s871_s27, %s871_s27 }
  0x4f   :  { %p878_p10 = por %p877_p9, %p876_p8 }
  0x51   :  { %p879_p11 = pnand %p878_p10, %p872_p7 }
  0x53   :  { %882 = shalt.err (!%p879_p11)
}
  0x54   :  { %79 = dma.hbm_to_vmem [thread:$0]  %s1092_s6, 2048, %s74_s10, [#allocation11], %s917_s1, %s917_s1, %s918_s25  }
  0x55   :  { %905 = dma.done.wait [#allocation5], 256  }
  0x56   :  { %906 = vsyncadd [#allocation5], 4294967040 }
  0x57   :  { %907 = dma.done.wait [#allocation8], 2304  }
  0x58   :  { %908 = vsyncadd [#allocation8], 4294964992 }
  0x59   :  { %909 = dma.done.wait [#allocation11], 3072  }
  0x5a   :  { %910 = vsyncadd [#allocation11], 4294964224  ;;  %v922_v0 = vmov 0   ;;  %v717_v1 = vld [vmem:[#allocation9 + $0x4] ss:$8 sps:$4 sm:$0xff]   ;;  %v1055_v13 = vld [vmem:[#allocation7] sm:$0xff] }
  0x5b   :  { %250 = vmatprep.mubr.bf16.mxu0 %v922_v0  ;;  %v719_v2 = vld [vmem:[#allocation9] ss:$8 sps:$4 sm:$0xff]   ;;  %218 = vmatprep.subr.bf16.mxu0 %v717_v1  ;;  %v720_v3 = vld [vmem:[#allocation9 + $0x14] ss:$8 sps:$4 sm:$0xff]   ;;  %v722_v4 = vld [vmem:[#allocation9 + $0x10] ss:$8 sps:$4 sm:$0xff]  }
  0x5c   :  { %219 = vmatpush1.bf16.msra.mxu0 %v719_v2  ;;  %v723_v5 = vld [vmem:[#allocation9 + $0x24] ss:$8 sps:$4 sm:$0xff]   ;;  %v725_v6 = vld [vmem:[#allocation9 + $0x20] ss:$8 sps:$4 sm:$0xff]   ;;  %v726_v7 = vld [vmem:[#allocation9 + $0x34] ss:$8 sps:$4 sm:$0xff]  }
  0x5d   :  { %220 = vmatprep.subr.bf16.mxu0 %v720_v3  ;;  %v728_v8 = vld [vmem:[#allocation9 + $0x30] ss:$8 sps:$4 sm:$0xff]   ;;  %v729_v9 = vld [vmem:[#allocation9 + $0x44] ss:$8 sps:$4 sm:$0xff]   ;;  %v731_v10 = vld [vmem:[#allocation9 + $0x40] ss:$8 sps:$4 sm:$0xff]  }
  0x5e   :  { %v100_v11 = vld [vmem:[#allocation4] sm:$0xff]  ;;  %v101_v12 = vld [vmem:[#allocation4 + $0x8] sm:$0xff]  ;;  %v1057_v14 = vld [vmem:[#allocation7 + $0x8] sm:$0xff]  ;;  %v923_v39 = vmov 0.0   ;;  %vm924_vm0 = vmmov 0  }
  0x5f   :  { %v732_v15 = vld [vmem:[#allocation9 + $0x54] ss:$8 sps:$4 sm:$0xff]   ;;  %v734_v16 = vld [vmem:[#allocation9 + $0x50] ss:$8 sps:$4 sm:$0xff]   ;;  %v735_v17 = vld [vmem:[#allocation9 + $0x64] ss:$8 sps:$4 sm:$0xff]   ;;  %v105_v18 = vsub.f32 %v100_v11, %v1055_v13  ;;  %v106_v19 = vsub.f32 %v101_v12, %v1057_v14 }
  0x60   :  { %221 = vmatpush1.bf16.msra.mxu0 %v722_v4  ;;  %v609_v20 = vld [vmem:[%s1088_s2] ss:$0 sm:$0xff]  ;;  %v751_v26 = vld [vmem:[#allocation12 + $0x48] sm:$0xff]   ;;  %v738_v27 = vld [vmem:[#allocation9 + $0x74] ss:$8 sps:$4 sm:$0xff]  }
  0x61   :  { %222 = vmatprep.subr.bf16.mxu0 %v723_v5  ;;  %v748_v21 = vld [vmem:[#allocation12 + $0x40] sm:$0xff]   ;;  %v113_v24 = vmul.f32 %v609_v20, %v105_v18  ;;  %v114_v25 = vmul.f32 %v609_v20, %v106_v19  ;;  %v752_v28 = vld [vmem:[#allocation12 + $0x8] sm:$0xff]   ;;  %v753_v29 = vld [vmem:[#allocation12 + $0x50] sm:$0xff]  }
  0x62   :  { %v749_v22 = vld [vmem:[#allocation12] sm:$0xff]   ;;  %653 = vmatprep.subr.bf16.mxu1 %v748_v21  ;;  %v740_v30 = vld [vmem:[#allocation9 + $0x70] ss:$8 sps:$4 sm:$0xff]   ;;  %v742_v40 = vld [vmem:[#allocation10 + $0x8] sm:$0xff]  }
  0x63   :  { %v737_v23 = vld [vmem:[#allocation9 + $0x60] ss:$8 sps:$4 sm:$0xff]   ;;  %654 = vmatpush3.bf16.msra.mxu1 %v749_v22  ;;  %v115_v31 = vadd.f32 %v113_v24, %v1055_v13  ;;  %v116_v32 = vadd.f32 %v114_v25, %v1057_v14  ;;  %v754_v33 = vld [vmem:[#allocation12 + $0x10] sm:$0xff]   ;;  %v755_v34 = vld [vmem:[#allocation12 + $0x58] sm:$0xff]  }
  0x64   :  { %223 = vmatpush1.bf16.msra.mxu0 %v725_v6  ;;  %655 = vmatprep.subr.bf16.mxu1 %v751_v26  ;;  %v741_v35 = vld [vmem:[#allocation10] sm:$0xff]   ;;  %v756_v37 = vld [vmem:[#allocation12 + $0x18] sm:$0xff]   ;;  %v759_v42 = vld [vmem:[#allocation12 + $0x68] sm:$0xff]  }
  0x65   :  { %224 = vmatprep.subr.bf16.mxu0 %v726_v7  ;;  %v117_v36 = vpack.c.bf16 %v116_v32, %v115_v31  ;;  %v757_v38 = vld [vmem:[#allocation12 + $0x60] sm:$0xff]   ;;  %v743_v43 = vld [vmem:[#allocation10 + $0x10] sm:$0xff]   ;;  %v744_v44 = vld [vmem:[#allocation10 + $0x18] sm:$0xff]  }
  0x66   :  { %v758_v41 = vld [vmem:[#allocation12 + $0x20] sm:$0xff]   ;;  %v746_v46 = vld [vmem:[#allocation10 + $0x28] sm:$0xff]   ;;  %v747_v50 = vld [vmem:[#allocation10 + $0x30] sm:$0xff]  }
  0x67   :  { %656 = vmatpush3.bf16.msra.mxu1 %v752_v28  ;;  %v745_v45 = vld [vmem:[#allocation10 + $0x20] sm:$0xff]   ;;  %v750_v53 = vld [vmem:[#allocation10 + $0x38] sm:$0xff]   ;;  %v760_v55 = vld [vmem:[#allocation12 + $0x28] sm:$0xff]  }
  0x68   :  { %225 = vmatpush1.bf16.msra.mxu0 %v728_v8  ;;  %657 = vmatprep.subr.bf16.mxu1 %v753_v29  ;;  %v642_v47 = vld [vmem:[%s1089_s3] ss:$0 sm:$0xff]  ;;  %v761_v56 = vld [vmem:[#allocation12 + $0x70] sm:$0xff]   ;;  %v763_v58 = vld [vmem:[#allocation12 + $0x78] sm:$0xff]   ;;  %s925_s3 = smov [#allocation13]  }
  0x69   :  { %226 = vmatprep.subr.bf16.mxu0 %v729_v9  ;;  %v462_v48 = vmul.f32 %v642_v47, %v105_v18  ;;  %v463_v49 = vmul.f32 %v642_v47, %v106_v19  ;;  %v762_v57 = vld [vmem:[#allocation12 + $0x30] sm:$0xff]   ;;  %v764_v59 = vld [vmem:[#allocation12 + $0x38] sm:$0xff]   ;;  %s595_s19 = sshll.u32 %s925_s3, 4  ;;  %s596_s19 = int_to_ptr.vmem [resolvable:$true] %s595_s19 }
  0x6a   :  { %s883_s20 = scalar_lea.vmem %s596_s19, 256  ;;  %p888_p13 = scmp.lt.s32.totalorder %s596_s19, %s596_s19 }
  0x6b   :  { %658 = vmatpush3.bf16.msra.mxu1 %v754_v33  ;;  %v464_v51 = vadd.f32 %v462_v48, %v1055_v13  ;;  %v465_v52 = vadd.f32 %v463_v49, %v1057_v14  ;;  %p884_p12 = scmp.ne.s32.totalorder %s596_s19, %s883_s20  ;;  %p889_p0 = scmp.lt.s32.totalorder %s883_s20, %s883_s20 }
  0x6c   :  { %227 = vmatpush1.bf16.msra.mxu0 %v731_v10  ;;  %659 = vmatprep.subr.bf16.mxu1 %v755_v34 }
  0x6d   :  { %228 = vmatprep.subr.bf16.mxu0 %v732_v15  ;;  %v466_v54 = vpack.c.bf16 %v465_v52, %v464_v51  ;;  %p890_p1 = por %p889_p0, %p888_p13 }
  0x6f   :  { %660 = vmatpush3.bf16.msra.mxu1 %v756_v37  ;;  %p891_p2 = pnand %p890_p1, %p884_p12 }
  0x70   :  { %229 = vmatpush1.bf16.msra.mxu0 %v734_v16  ;;  %661 = vmatprep.subr.bf16.mxu1 %v757_v38 }
  0x71   :  { %230 = vmatprep.subr.bf16.mxu0 %v735_v17 }
  0x73   :  { %662 = vmatpush3.bf16.msra.mxu1 %v758_v41 }
  0x74   :  { %231 = vmatpush1.bf16.msra.mxu0 %v737_v23  ;;  %663 = vmatprep.subr.bf16.mxu1 %v759_v42 }
  0x75   :  { %232 = vmatprep.subr.bf16.mxu0 %v738_v27 }
  0x77   :  { %664 = vmatpush3.bf16.msra.mxu1 %v760_v55 }
  0x78   :  { %233 = vmatpush1.bf16.msra.mxu0 %v740_v30  ;;  %665 = vmatprep.subr.bf16.mxu1 %v761_v56 }
  0x79   :  { %684 = vmatprep.subr.bf16.mxu0 %v923_v39 }
  0x7b   :  { %251 = vmatmul.mubr.bf16.vlgmr.msra.gmra.mrb[0].mxu0 %v117_v36  ;;  %666 = vmatpush3.bf16.msra.mxu1 %v762_v57 }
  0x7c   :  { %685 = vmatpush3.bf16.msra.mxu0 %v741_v35  ;;  %700 = vmatprep.mubr.msk.bf16.mxu0 %vm924_vm0, %v923_v39 }
  0x7d   :  { %686 = vmatprep.subr.bf16.mxu0 %v923_v39  ;;  %667 = vmatprep.subr.bf16.mxu1 %v763_v58 }
  0x7f   :  { %668 = vmatpush3.bf16.msra.mxu1 %v764_v59 }
  0x80   :  { %687 = vmatpush3.bf16.msra.mxu0 %v742_v40 }
  0x81   :  { %688 = vmatprep.subr.bf16.mxu0 %v923_v39 }
  0x84   :  { %689 = vmatpush3.bf16.msra.mxu0 %v743_v43 }
  0x85   :  { %690 = vmatprep.subr.bf16.mxu0 %v923_v39 }
  0x88   :  { %691 = vmatpush3.bf16.msra.mxu0 %v744_v44 }
  0x89   :  { %692 = vmatprep.subr.bf16.mxu0 %v923_v39 }
  0x8c   :  { %693 = vmatpush3.bf16.msra.mxu0 %v745_v45 }
  0x8d   :  { %694 = vmatprep.subr.bf16.mxu0 %v923_v39 }
  0x90   :  { %695 = vmatpush3.bf16.msra.mxu0 %v746_v46 }
  0x91   :  { %696 = vmatprep.subr.bf16.mxu0 %v923_v39 }
  0x94   :  { %697 = vmatpush3.bf16.msra.mxu0 %v747_v50 }
  0x95   :  { %698 = vmatprep.subr.bf16.mxu0 %v923_v39 }
  0x98   :  { %699 = vmatpush3.bf16.msra.mxu0 %v750_v53 }
  0x9b   :  { %701 = vmatmul.mubr.bf16.vlgmr.msra.gmra.mrb[4].mxu0 %v466_v54 }
 0x14e   :  { %v252_v60 = vpop.f32.mrb[0].mxu0 }
 0x14f   :  { %v261_v61 = vmax.f32 %v252_v60, 0.0  ;;  %v254_v62 = vpop.f32.mrb[1].mxu0 }
 0x150   :  { %v262_v63 = vmax.f32 %v254_v62, 0.0  ;;  %v256_v0 = vpop.f32.mrb[2].mxu0 }
 0x151   :  { %v263_v1 = vmax.f32 %v256_v0, 0.0  ;;  %v258_v2 = vpop.f32.mrb[3].mxu0  ;;  %v267_v4 = vmul.f32 %v261_v61, %v261_v61 }
 0x152   :  { %v264_v3 = vmax.f32 %v258_v2, 0.0  ;;  %v268_v6 = vmul.f32 %v262_v63, %v262_v63 }
 0x153   :  { %v269_v5 = vmul.f32 %v263_v1, %v263_v1 }
 0x154   :  { %v270_v7 = vmul.f32 %v264_v3, %v264_v3 }
 0x155   :  { %v271_v8 = vpack.c.bf16 %v269_v5, %v267_v4 }
 0x156   :  { %v272_v9 = vpack.c.bf16 %v270_v7, %v268_v6 }
 0x158   :  { %433 = vmatprep.mubr.bf16.mxu1 %v272_v9 }
 0x159   :  { %434 = vmatmul.mubr.bf16.vlgmr.msra.gmra.mrb[0].mxu1 %v271_v8 }
 0x16e   :  { %v565_v10 = vpop.f32.mrb[4].mxu0 }
 0x16f   :  { %v702_v11 = vpop.f32.mrb[5].mxu0  ;;  %v651_v14 = vmul.f32 -1.442695, %v565_v10 }
 0x170   :  { %v568_v12 = vpop.f32.mrb[6].mxu0 }
 0x171   :  { %v703_v13 = vpop.f32.mrb[7].mxu0  ;;  %765 = vpow2.f32 %v651_v14  ;;  %v652_v15 = vmul.f32 -1.442695, %v568_v12 }
 0x173   :  { %767 = vpow2.f32 %v652_v15 }
 0x17b   :  { %v766_v16 = vpop.eup %765 }
 0x17c   :  { %v578_v17 = vadd.f32 1.0, %v766_v16 }
 0x17d   :  { %v768_v18 = vpop.eup %767 }
 0x17e   :  { %769 = vrcp.f32 %v578_v17  ;;  %v579_v19 = vadd.f32 1.0, %v768_v18 }
 0x180   :  { %771 = vrcp.f32 %v579_v19 }
 0x188   :  { %v770_v21 = vpop.eup %769 }
 0x18a   :  { %v772_v28 = vpop.eup %771 }
 0x22c   :  { %v669_v20 = vpop.f32.mrb[0].mxu1 }
 0x22d   :  { %v670_v22 = vpop.f32.mrb[1].mxu1 }
 0x22e   :  { %v671_v23 = vadd.f32 %v670_v22, %v669_v20  ;;  %v672_v24 = vpop.f32.mrb[2].mxu1 }
 0x22f   :  { %v673_v25 = vpop.f32.mrb[3].mxu1 }
 0x230   :  { %v586_v26 = vmul.f32 %v770_v21, %v671_v23  ;;  %v674_v27 = vadd.f32 %v673_v25, %v672_v24 }
 0x232   :  { %588 = vst [vmem:[#allocation13] sm:$0xff] %v586_v26  ;;  %v587_v29 = vmul.f32 %v772_v28, %v674_v27 }
 0x234   :  { %589 = vst [vmem:[#allocation13 + $0x8] sm:$0xff] %v587_v29 }
 0x235   :  { %894 = shalt.err (!%p891_p2)
}
 0x236   :  { %s895_s23 = scalar_lea.hbm %s1093_s7, 256 }
 0x237   :  { %p896_p3 = scmp.ne.s32.totalorder %s1093_s7, %s895_s23  ;;  %p899_p4 = scmp.lt.u32.totalorder %s895_s23, %s1093_s7 }
 0x239   :  { %p901_p5 = pnand %p899_p4, %p896_p3 }
 0x23b   :  { %904 = shalt.err (!%p901_p5)
}
 0x23c   :  { %601 = dma.vmem_to_hbm [thread:$0]  %s596_s19, 256, %s1093_s7, [#allocation6], %s915_s13, %s915_s13, %s916_s14  }
 0x23d   :  { %911 = dma.done.wait [#allocation6], 256  }
 0x23e   :  { %912 = vsyncadd [#allocation6], 4294967040 }
 0x23f   :  { %605 = vsyncpa [#allocation5], 1 }
 0x240   :  { %606 = vsyncpa [#allocation8], 1 }
 0x241   :  { %607 = vsyncpa [#allocation11], 1 }
 0x242   :  { %608 = vsyncpa [#allocation6], 1 }

// kernel: tpu_custom_call.1
= control target key start
LH: loop header
LB: loop body
LE: loop exit
PB: predicated region body
PF: predicated region fallthrough
CT: control target
= control target key end

     0   :  { %12 = vsyncpa [#allocation5], 0  ;;  %s1086_s0 = inlined_call_operand.hbm [shape: f32[16,128], index: 0, kind: input, shape index: {}]   ;;  %s1087_s1 = inlined_call_operand.hbm [shape: f32[16,128], index: 1, kind: input, shape index: {}]   ;;  %s1088_s2 = inlined_call_operand.vmem [shape: f32[1,128], index: 2, kind: input, shape index: {}]   ;;  %s1089_s3 = inlined_call_operand.vmem [shape: f32[1,128], index: 3, kind: input, shape index: {}]   ;;  %s1090_s4 = inlined_call_operand.hbm [shape: bf16[128,256], index: 4, kind: input, shape index: {}]   ;;  %s1091_s5 = inlined_call_operand.hbm [shape: bf16[128,128], index: 5, kind: input, shape index: {}]   ;;  %s1092_s6 = inlined_call_operand.hbm [shape: bf16[256,128], index: 6, kind: input, shape index: {}]   ;;  %s1093_s7 = inlined_call_operand.hbm [shape: f32[16,128], index: 7, kind: output, shape index: {}]  }
   0x1   :  { %13 = vsyncpa [#allocation8], 0 }
   0x2   :  { %14 = vsyncpa [#allocation11], 0 }
   0x3   :  { %15 = vsyncpa [#allocation6], 0  ;;  %s913_s24 = smov [#allocation7]   ;;  %s914_s26 = smov [#allocation10]  }
   0x4   :  { %s33_s25 = sshll.u32 %s913_s24, 4  ;;  %s61_s27 = sshll.u32 %s914_s26, 4  ;;  %s34_s25 = int_to_ptr.vmem [resolvable:$true] %s33_s25  ;;  %s966_s27 = int_to_ptr.vmem [resolvable:$true] %s61_s27 }
   0x5   :  { %s773_s30 = scalar_lea.hbm %s1087_s1, 256 }
   0x6   :  { %p774_p0 = scmp.ne.s32.totalorder %s1087_s1, %s773_s30  ;;  %p777_p1 = scmp.lt.u32.totalorder %s773_s30, %s1087_s1 }
   0x8   :  { %p779_p2 = pnand %p777_p1, %p774_p0 }
   0xa   :  { %782 = shalt.err (!%p779_p2)
}
   0xb   :  { %s783_s12 = scalar_lea.vmem %s34_s25, 256  ;;  %p788_p4 = scmp.lt.s32.totalorder %s34_s25, %s34_s25 }
   0xc   :  { %p784_p3 = scmp.ne.s32.totalorder %s34_s25, %s783_s12  ;;  %p789_p5 = scmp.lt.s32.totalorder %s783_s12, %s783_s12 }
   0xe   :  { %p790_p6 = por %p789_p5, %p788_p4 }
  0x10   :  { %p791_p7 = pnand %p790_p6, %p784_p3 }
  0x12   :  { %794 = shalt.err (!%p791_p7)
}
  0x13   :  { %s915_s13 = smov 128   ;;  %s916_s14 = smov 8  }
  0x14   :  { %39 = dma.hbm_to_vmem [thread:$0]  %s1087_s1, 256, %s34_s25, [#allocation8], %s915_s13, %s915_s13, %s916_s14  }
  0x15   :  { %s795_s19 = scalar_lea.hbm %s1091_s5, 1024 }
  0x16   :  { %p796_p8 = scmp.ne.s32.totalorder %s1091_s5, %s795_s19  ;;  %p799_p9 = scmp.lt.u32.totalorder %s795_s19, %s1091_s5 }
  0x18   :  { %p801_p10 = pnand %p799_p9, %p796_p8 }
  0x1a   :  { %804 = shalt.err (!%p801_p10)
}
  0x1b   :  { %s805_s24 = scalar_lea.vmem %s966_s27, 1024  ;;  %p810_p12 = scmp.lt.s32.totalorder %s966_s27, %s966_s27 }
  0x1c   :  { %p806_p11 = scmp.ne.s32.totalorder %s966_s27, %s805_s24  ;;  %p811_p13 = scmp.lt.s32.totalorder %s805_s24, %s805_s24 }
  0x1e   :  { %p812_p0 = por %p811_p13, %p810_p12 }
  0x20   :  { %p813_p1 = pnand %p812_p0, %p806_p11 }
  0x22   :  { %816 = shalt.err (!%p813_p1)
}
  0x23   :  { %s917_s1 = smov 64   ;;  %s918_s25 = smov 4  }
  0x24   :  { %67 = dma.hbm_to_vmem [thread:$0]  %s1091_s5, 1024, %s966_s27, [#allocation11], %s917_s1, %s917_s1, %s918_s25  }
  0x25   :  { %s919_s29 = smov [#allocation4]   ;;  %s920_s8 = smov [#allocation9]  }
  0x26   :  { %s21_s30 = sshll.u32 %s919_s29, 4  ;;  %s49_s9 = sshll.u32 %s920_s8, 4  ;;  %s22_s30 = int_to_ptr.vmem [resolvable:$true] %s21_s30  ;;  %s1003_s9 = int_to_ptr.vmem [resolvable:$true] %s49_s9 }
  0x27   :  { %s817_s12 = scalar_lea.hbm %s1086_s0, 256 }
  0x28   :  { %p818_p2 = scmp.ne.s32.totalorder %s1086_s0, %s817_s12  ;;  %p821_p3 = scmp.lt.u32.totalorder %s817_s12, %s1086_s0 }
  0x2a   :  { %p823_p4 = pnand %p821_p3, %p818_p2 }
  0x2c   :  { %826 = shalt.err (!%p823_p4)
}
  0x2d   :  { %s827_s5 = scalar_lea.vmem %s22_s30, 256  ;;  %p832_p6 = scmp.lt.s32.totalorder %s22_s30, %s22_s30 }
  0x2e   :  { %p828_p5 = scmp.ne.s32.totalorder %s22_s30, %s827_s5  ;;  %p833_p7 = scmp.lt.s32.totalorder %s827_s5, %s827_s5 }
  0x30   :  { %p834_p8 = por %p833_p7, %p832_p6 }
  0x32   :  { %p835_p9 = pnand %p834_p8, %p828_p5 }
  0x34   :  { %838 = shalt.err (!%p835_p9)
}
  0x35   :  { %27 = dma.hbm_to_vmem [thread:$0]  %s1086_s0, 256, %s22_s30, [#allocation5], %s915_s13, %s915_s13, %s916_s14  }
  0x36   :  { %s839_s22 = scalar_lea.hbm %s1090_s4, 2048 }
  0x37   :  { %p840_p10 = scmp.ne.s32.totalorder %s1090_s4, %s839_s22  ;;  %p843_p11 = scmp.lt.u32.totalorder %s839_s22, %s1090_s4 }
  0x39   :  { %p845_p12 = pnand %p843_p11, %p840_p10 }
  0x3b   :  { %848 = shalt.err (!%p845_p12)
}
  0x3c   :  { %s849_s29 = scalar_lea.vmem %s1003_s9, 2048  ;;  %p854_p0 = scmp.lt.s32.totalorder %s1003_s9, %s1003_s9 }
  0x3d   :  { %p850_p13 = scmp.ne.s32.totalorder %s1003_s9, %s849_s29  ;;  %p855_p1 = scmp.lt.s32.totalorder %s849_s29, %s849_s29 }
  0x3f   :  { %p856_p2 = por %p855_p1, %p854_p0 }
  0x41   :  { %p857_p3 = pnand %p856_p2, %p850_p13 }
  0x43   :  { %860 = shalt.err (!%p857_p3)
}
  0x44   :  { %55 = dma.hbm_to_vmem [thread:$0]  %s1090_s4, 2048, %s1003_s9, [#allocation8], %s915_s13, %s915_s13, %s916_s14  }
  0x45   :  { %s921_s8 = smov [#allocation12]   ;;  %s861_s15 = scalar_lea.hbm %s1092_s6, 2048 }
  0x46   :  { %s73_s10 = sshll.u32 %s921_s8, 4  ;;  %p862_p4 = scmp.ne.s32.totalorder %s1092_s6, %s861_s15  ;;  %s74_s10 = int_to_ptr.vmem [resolvable:$true] %s73_s10 }
  0x47   :  { %p865_p5 = scmp.lt.u32.totalorder %s861_s15, %s1092_s6 }
  0x49   :  { %p867_p6 = pnand %p865_p5, %p862_p4 }
  0x4b   :  { %870 = shalt.err (!%p867_p6)
}
  0x4c   :  { %s871_s27 = scalar_lea.vmem %s74_s10, 2048  ;;  %p876_p8 = scmp.lt.s32.totalorder %s74_s10, %s74_s10 }
  0x4d   :  { %p872_p7 = scmp.ne.s32.totalorder %s74_s10, %s871_s27  ;;  %p877_p9 = scmp.lt.s32.totalorder %s871_s27, %s871_s27 }
  0x4f   :  { %p878_p10 = por %p877_p9, %p876_p8 }
  0x51   :  { %p879_p11 = pnand %p878_p10, %p872_p7 }
  0x53   :  { %882 = shalt.err (!%p879_p11)
}
  0x54   :  { %79 = dma.hbm_to_vmem [thread:$0]  %s1092_s6, 2048, %s74_s10, [#allocation11], %s917_s1, %s917_s1, %s918_s25  }
  0x55   :  { %905 = dma.done.wait [#allocation5], 256  }
  0x56   :  { %906 = vsyncadd [#allocation5], 4294967040 }
  0x57   :  { %907 = dma.done.wait [#allocation8], 2304  }
  0x58   :  { %908 = vsyncadd [#allocation8], 4294964992 }
  0x59   :  { %909 = dma.done.wait [#allocation11], 3072  }
  0x5a   :  { %910 = vsyncadd [#allocation11], 4294964224  ;;  %v922_v0 = vmov 0   ;;  %v717_v1 = vld [vmem:[#allocation9 + $0x4] ss:$8 sps:$4 sm:$0xff]   ;;  %v1055_v13 = vld [vmem:[#allocation7] sm:$0xff] }
  0x5b   :  { %250 = vmatprep.mubr.bf16.mxu0 %v922_v0  ;;  %v719_v2 = vld [vmem:[#allocation9] ss:$8 sps:$4 sm:$0xff]   ;;  %218 = vmatprep.subr.bf16.mxu0 %v717_v1  ;;  %v720_v3 = vld [vmem:[#allocation9 + $0x14] ss:$8 sps:$4 sm:$0xff]   ;;  %v722_v4 = vld [vmem:[#allocation9 + $0x10] ss:$8 sps:$4 sm:$0xff]  }
  0x5c   :  { %219 = vmatpush1.bf16.msra.mxu0 %v719_v2  ;;  %v723_v5 = vld [vmem:[#allocation9 + $0x24] ss:$8 sps:$4 sm:$0xff]   ;;  %v725_v6 = vld [vmem:[#allocation9 + $0x20] ss:$8 sps:$4 sm:$0xff]   ;;  %v726_v7 = vld [vmem:[#allocation9 + $0x34] ss:$8 sps:$4 sm:$0xff]  }
  0x5d   :  { %220 = vmatprep.subr.bf16.mxu0 %v720_v3  ;;  %v728_v8 = vld [vmem:[#allocation9 + $0x30] ss:$8 sps:$4 sm:$0xff]   ;;  %v729_v9 = vld [vmem:[#allocation9 + $0x44] ss:$8 sps:$4 sm:$0xff]   ;;  %v731_v10 = vld [vmem:[#allocation9 + $0x40] ss:$8 sps:$4 sm:$0xff]  }
  0x5e   :  { %v100_v11 = vld [vmem:[#allocation4] sm:$0xff]  ;;  %v101_v12 = vld [vmem:[#allocation4 + $0x8] sm:$0xff]  ;;  %v1057_v14 = vld [vmem:[#allocation7 + $0x8] sm:$0xff]  ;;  %v923_v39 = vmov 0.0   ;;  %vm924_vm0 = vmmov 0  }
  0x5f   :  { %v732_v15 = vld [vmem:[#allocation9 + $0x54] ss:$8 sps:$4 sm:$0xff]   ;;  %v734_v16 = vld [vmem:[#allocation9 + $0x50] ss:$8 sps:$4 sm:$0xff]   ;;  %v735_v17 = vld [vmem:[#allocation9 + $0x64] ss:$8 sps:$4 sm:$0xff]   ;;  %v105_v18 = vsub.f32 %v100_v11, %v1055_v13  ;;  %v106_v19 = vsub.f32 %v101_v12, %v1057_v14 }
  0x60   :  { %221 = vmatpush1.bf16.msra.mxu0 %v722_v4  ;;  %v609_v20 = vld [vmem:[%s1088_s2] ss:$0 sm:$0xff]  ;;  %v751_v26 = vld [vmem:[#allocation12 + $0x48] sm:$0xff]   ;;  %v738_v27 = vld [vmem:[#allocation9 + $0x74] ss:$8 sps:$4 sm:$0xff]  }
  0x61   :  { %222 = vmatprep.subr.bf16.mxu0 %v723_v5  ;;  %v748_v21 = vld [vmem:[#allocation12 + $0x40] sm:$0xff]   ;;  %v113_v24 = vmul.f32 %v609_v20, %v105_v18  ;;  %v114_v25 = vmul.f32 %v609_v20, %v106_v19  ;;  %v752_v28 = vld [vmem:[#allocation12 + $0x8] sm:$0xff]   ;;  %v753_v29 = vld [vmem:[#allocation12 + $0x50] sm:$0xff]  }
  0x62   :  { %v749_v22 = vld [vmem:[#allocation12] sm:$0xff]   ;;  %653 = vmatprep.subr.bf16.mxu1 %v748_v21  ;;  %v740_v30 = vld [vmem:[#allocation9 + $0x70] ss:$8 sps:$4 sm:$0xff]   ;;  %v742_v40 = vld [vmem:[#allocation10 + $0x8] sm:$0xff]  }
  0x63   :  { %v737_v23 = vld [vmem:[#allocation9 + $0x60] ss:$8 sps:$4 sm:$0xff]   ;;  %654 = vmatpush3.bf16.msra.mxu1 %v749_v22  ;;  %v115_v31 = vadd.f32 %v113_v24, %v1055_v13  ;;  %v116_v32 = vadd.f32 %v114_v25, %v1057_v14  ;;  %v754_v33 = vld [vmem:[#allocation12 + $0x10] sm:$0xff]   ;;  %v755_v34 = vld [vmem:[#allocation12 + $0x58] sm:$0xff]  }
  0x64   :  { %223 = vmatpush1.bf16.msra.mxu0 %v725_v6  ;;  %655 = vmatprep.subr.bf16.mxu1 %v751_v26  ;;  %v741_v35 = vld [vmem:[#allocation10] sm:$0xff]   ;;  %v756_v37 = vld [vmem:[#allocation12 + $0x18] sm:$0xff]   ;;  %v759_v42 = vld [vmem:[#allocation12 + $0x68] sm:$0xff]  }
  0x65   :  { %224 = vmatprep.subr.bf16.mxu0 %v726_v7  ;;  %v117_v36 = vpack.c.bf16 %v116_v32, %v115_v31  ;;  %v757_v38 = vld [vmem:[#allocation12 + $0x60] sm:$0xff]   ;;  %v743_v43 = vld [vmem:[#allocation10 + $0x10] sm:$0xff]   ;;  %v744_v44 = vld [vmem:[#allocation10 + $0x18] sm:$0xff]  }
  0x66   :  { %v758_v41 = vld [vmem:[#allocation12 + $0x20] sm:$0xff]   ;;  %v746_v46 = vld [vmem:[#allocation10 + $0x28] sm:$0xff]   ;;  %v747_v50 = vld [vmem:[#allocation10 + $0x30] sm:$0xff]  }
  0x67   :  { %656 = vmatpush3.bf16.msra.mxu1 %v752_v28  ;;  %v745_v45 = vld [vmem:[#allocation10 + $0x20] sm:$0xff]   ;;  %v750_v53 = vld [vmem:[#allocation10 + $0x38] sm:$0xff]   ;;  %v760_v55 = vld [vmem:[#allocation12 + $0x28] sm:$0xff]  }
  0x68   :  { %225 = vmatpush1.bf16.msra.mxu0 %v728_v8  ;;  %657 = vmatprep.subr.bf16.mxu1 %v753_v29  ;;  %v642_v47 = vld [vmem:[%s1089_s3] ss:$0 sm:$0xff]  ;;  %v761_v56 = vld [vmem:[#allocation12 + $0x70] sm:$0xff]   ;;  %v763_v58 = vld [vmem:[#allocation12 + $0x78] sm:$0xff]   ;;  %s925_s3 = smov [#allocation13]  }
  0x69   :  { %226 = vmatprep.subr.bf16.mxu0 %v729_v9  ;;  %v462_v48 = vmul.f32 %v642_v47, %v105_v18  ;;  %v463_v49 = vmul.f32 %v642_v47, %v106_v19  ;;  %v762_v57 = vld [vmem:[#allocation12 + $0x30] sm:$0xff]   ;;  %v764_v59 = vld [vmem:[#allocation12 + $0x38] sm:$0xff]   ;;  %s595_s19 = sshll.u32 %s925_s3, 4  ;;  %s596_s19 = int_to_ptr.vmem [resolvable:$true] %s595_s19 }
  0x6a   :  { %s883_s20 = scalar_lea.vmem %s596_s19, 256  ;;  %p888_p13 = scmp.lt.s32.totalorder %s596_s19, %s596_s19 }
  0x6b   :  { %658 = vmatpush3.bf16.msra.mxu1 %v754_v33  ;;  %v464_v51 = vadd.f32 %v462_v48, %v1055_v13  ;;  %v465_v52 = vadd.f32 %v463_v49, %v1057_v14  ;;  %p884_p12 = scmp.ne.s32.totalorder %s596_s19, %s883_s20  ;;  %p889_p0 = scmp.lt.s32.totalorder %s883_s20, %s883_s20 }
  0x6c   :  { %227 = vmatpush1.bf16.msra.mxu0 %v731_v10  ;;  %659 = vmatprep.subr.bf16.mxu1 %v755_v34 }
  0x6d   :  { %228 = vmatprep.subr.bf16.mxu0 %v732_v15  ;;  %v466_v54 = vpack.c.bf16 %v465_v52, %v464_v51  ;;  %p890_p1 = por %p889_p0, %p888_p13 }
  0x6f   :  { %660 = vmatpush3.bf16.msra.mxu1 %v756_v37  ;;  %p891_p2 = pnand %p890_p1, %p884_p12 }
  0x70   :  { %229 = vmatpush1.bf16.msra.mxu0 %v734_v16  ;;  %661 = vmatprep.subr.bf16.mxu1 %v757_v38 }
  0x71   :  { %230 = vmatprep.subr.bf16.mxu0 %v735_v17 }
  0x73   :  { %662 = vmatpush3.bf16.msra.mxu1 %v758_v41 }
  0x74   :  { %231 = vmatpush1.bf16.msra.mxu0 %v737_v23  ;;  %663 = vmatprep.subr.bf16.mxu1 %v759_v42 }
  0x75   :  { %232 = vmatprep.subr.bf16.mxu0 %v738_v27 }
  0x77   :  { %664 = vmatpush3.bf16.msra.mxu1 %v760_v55 }
  0x78   :  { %233 = vmatpush1.bf16.msra.mxu0 %v740_v30  ;;  %665 = vmatprep.subr.bf16.mxu1 %v761_v56 }
  0x79   :  { %684 = vmatprep.subr.bf16.mxu0 %v923_v39 }
  0x7b   :  { %251 = vmatmul.mubr.bf16.vlgmr.msra.gmra.mrb[0].mxu0 %v117_v36  ;;  %666 = vmatpush3.bf16.msra.mxu1 %v762_v57 }
  0x7c   :  { %685 = vmatpush3.bf16.msra.mxu0 %v741_v35  ;;  %700 = vmatprep.mubr.msk.bf16.mxu0 %vm924_vm0, %v923_v39 }
  0x7d   :  { %686 = vmatprep.subr.bf16.mxu0 %v923_v39  ;;  %667 = vmatprep.subr.bf16.mxu1 %v763_v58 }
  0x7f   :  { %668 = vmatpush3.bf16.msra.mxu1 %v764_v59 }
  0x80   :  { %687 = vmatpush3.bf16.msra.mxu0 %v742_v40 }
  0x81   :  { %688 = vmatprep.subr.bf16.mxu0 %v923_v39 }
  0x84   :  { %689 = vmatpush3.bf16.msra.mxu0 %v743_v43 }
  0x85   :  { %690 = vmatprep.subr.bf16.mxu0 %v923_v39 }
  0x88   :  { %691 = vmatpush3.bf16.msra.mxu0 %v744_v44 }
  0x89   :  { %692 = vmatprep.subr.bf16.mxu0 %v923_v39 }
  0x8c   :  { %693 = vmatpush3.bf16.msra.mxu0 %v745_v45 }
  0x8d   :  { %694 = vmatprep.subr.bf16.mxu0 %v923_v39 }
  0x90   :  { %695 = vmatpush3.bf16.msra.mxu0 %v746_v46 }
  0x91   :  { %696 = vmatprep.subr.bf16.mxu0 %v923_v39 }
  0x94   :  { %697 = vmatpush3.bf16.msra.mxu0 %v747_v50 }
  0x95   :  { %698 = vmatprep.subr.bf16.mxu0 %v923_v39 }
  0x98   :  { %699 = vmatpush3.bf16.msra.mxu0 %v750_v53 }
  0x9b   :  { %701 = vmatmul.mubr.bf16.vlgmr.msra.gmra.mrb[4].mxu0 %v466_v54 }
 0x14e   :  { %v252_v60 = vpop.f32.mrb[0].mxu0 }
 0x14f   :  { %v261_v61 = vmax.f32 %v252_v60, 0.0  ;;  %v254_v62 = vpop.f32.mrb[1].mxu0 }
 0x150   :  { %v262_v63 = vmax.f32 %v254_v62, 0.0  ;;  %v256_v0 = vpop.f32.mrb[2].mxu0 }
 0x151   :  { %v263_v1 = vmax.f32 %v256_v0, 0.0  ;;  %v258_v2 = vpop.f32.mrb[3].mxu0  ;;  %v267_v4 = vmul.f32 %v261_v61, %v261_v61 }
 0x152   :  { %v264_v3 = vmax.f32 %v258_v2, 0.0  ;;  %v268_v6 = vmul.f32 %v262_v63, %v262_v63 }
 0x153   :  { %v269_v5 = vmul.f32 %v263_v1, %v263_v1 }
 0x154   :  { %v270_v7 = vmul.f32 %v264_v3, %v264_v3 }
 0x155   :  { %v271_v8 = vpack.c.bf16 %v269_v5, %v267_v4 }
 0x156   :  { %v272_v9 = vpack.c.bf16 %v270_v7, %v268_v6 }
 0x158   :  { %433 = vmatprep.mubr.bf16.mxu1 %v272_v9 }
 0x159   :  { %434 = vmatmul.mubr.bf16.vlgmr.msra.gmra.mrb[0].mxu1 %v271_v8 }
 0x16e   :  { %v565_v10 = vpop.f32.mrb[4].mxu0 }
 0x16f   :  { %v702_v11 = vpop.f32.mrb[5].mxu0  ;;  %v651_v14 = vmul.f32 -1.442695, %v565_v10 }
 0x170   :  { %v568_v12 = vpop.f32.mrb[6].mxu0 }
 0x171   :  { %v703_v13 = vpop.f32.mrb[7].mxu0  ;;  %765 = vpow2.f32 %v651_v14  ;;  %v652_v15 = vmul.f32 -1.442695, %v568_v12 }
 0x173   :  { %767 = vpow2.f32 %v652_v15 }
 0x17b   :  { %v766_v16 = vpop.eup %765 }
 0x17c   :  { %v578_v17 = vadd.f32 1.0, %v766_v16 }
 0x17d   :  { %v768_v18 = vpop.eup %767 }
 0x17e   :  { %769 = vrcp.f32 %v578_v17  ;;  %v579_v19 = vadd.f32 1.0, %v768_v18 }
 0x180   :  { %771 = vrcp.f32 %v579_v19 }
 0x188   :  { %v770_v21 = vpop.eup %769 }
 0x18a   :  { %v772_v28 = vpop.eup %771 }
 0x22c   :  { %v669_v20 = vpop.f32.mrb[0].mxu1 }
 0x22d   :  { %v670_v22 = vpop.f32.mrb[1].mxu1 }
 0x22e   :  { %v671_v23 = vadd.f32 %v670_v22, %v669_v20  ;;  %v672_v24 = vpop.f32.mrb[2].mxu1 }
 0x22f   :  { %v673_v25 = vpop.f32.mrb[3].mxu1 }
 0x230   :  { %v586_v26 = vmul.f32 %v770_v21, %v671_v23  ;;  %v674_v27 = vadd.f32 %v673_v25, %v672_v24 }
 0x232   :  { %588 = vst [vmem:[#allocation13] sm:$0xff] %v586_v26  ;;  %v587_v29 = vmul.f32 %v772_v28, %v674_v27 }
 0x234   :  { %589 = vst [vmem:[#allocation13 + $0x8] sm:$0xff] %v587_v29 }
 0x235   :  { %894 = shalt.err (!%p891_p2)
}
 0x236   :  { %s895_s23 = scalar_lea.hbm %s1093_s7, 256 }
 0x237   :  { %p896_p3 = scmp.ne.s32.totalorder %s1093_s7, %s895_s23  ;;  %p899_p4 = scmp.lt.u32.totalorder %s895_s23, %s1093_s7 }
 0x239   :  { %p901_p5 = pnand %p899_p4, %p896_p3 }
 0x23b   :  { %904 = shalt.err (!%p901_p5)
}
 0x23c   :  { %601 = dma.vmem_to_hbm [thread:$0]  %s596_s19, 256, %s1093_s7, [#allocation6], %s915_s13, %s915_s13, %s916_s14  }
 0x23d   :  { %911 = dma.done.wait [#allocation6], 256  }
 0x23e   :  { %912 = vsyncadd [#allocation6], 4294967040 }
 0x23f   :  { %605 = vsyncpa [#allocation5], 1 }
 0x240   :  { %606 = vsyncpa [#allocation8], 1 }
 0x241   :  { %607 = vsyncpa [#allocation11], 1 }
 0x242   :  { %608 = vsyncpa [#allocation6], 1 }

</bundles_post_ra>
